<compile_context>
chip_gen: v5e
topology: v5e:2x2
jax: 0.10.0
libtpu: 0.0.40
codegen_flags: <defaults>
</compile_context>

<pallas_src>
import functools

import numpy as np
import jax
import jax.numpy as jnp
from jax import lax
from jax.experimental import pallas as pl
from jax.experimental.pallas import tpu as pltpu

LANES = 128  # pad the batch axis to a full vreg lane width


# --------------------------------------------------------------------------
# Forward: out = x @ W^T + b, computed entirely on the VPU (no MXU, no XLU).
# --------------------------------------------------------------------------
def _linear_forward_kernel(xT_ref, w_ref, b_ref, outT_ref):
    # xT_ref : (in_f, Np) f32 VMEM  (batch lane-dense, zero padded to Np lanes)
    # w_ref  : (in_f,)    f32 SMEM  (flattened torch (1, in) weight)
    # b_ref  : (1,)       f32 SMEM
    # outT_ref: (1, Np)   f32 VMEM  (lane-dense, unmasked store)
    acc = jnp.full(outT_ref.shape, b_ref[0], dtype=jnp.float32)
    for i in range(xT_ref.shape[0]):            # static unroll over in_features (== 2)
        acc = acc + xT_ref[i:i + 1, :] * w_ref[i]
    outT_ref[...] = acc


@jax.jit
def linear_forward(x, w, b):
    """x: (N, in), w: (out=1, in), b: (out=1,) -> (N, 1), all float32."""
    n, in_f = x.shape
    out_f = w.shape[0]
    n_pad = max(LANES, pl.cdiv(n, LANES) * LANES)
    xT = jnp.asarray(x, jnp.float32).T                       # (in_f, N)
    xT = jnp.pad(xT, ((0, 0), (0, n_pad - n)))               # (in_f, Np) lane-dense
    w_flat = jnp.asarray(w, jnp.float32).reshape(-1)          # (in_f,) scalars in SMEM
    b_flat = jnp.asarray(b, jnp.float32).reshape(-1)          # (1,)

    outT = pl.pallas_call(
        _linear_forward_kernel,
        out_shape=jax.ShapeDtypeStruct((out_f, n_pad), jnp.float32),
        in_specs=[
            pl.BlockSpec(memory_space=pltpu.MemorySpace.VMEM),   # xT
            pl.BlockSpec(memory_space=pltpu.MemorySpace.SMEM),   # W
            pl.BlockSpec(memory_space=pltpu.MemorySpace.SMEM),   # b
        ],
        out_specs=pl.BlockSpec(memory_space=pltpu.MemorySpace.VMEM),
    )(xT, w_flat, b_flat)
    return outT[:, :n].T                                      # back to torch layout (N, 1)


# --------------------------------------------------------------------------
# Fused training loop: forward + MSE gradient + SGD update for `epochs` steps,
# all inside ONE pallas_call. One XLU lane-reduce per epoch.
# --------------------------------------------------------------------------
def _fused_train_kernel(xs_ref, p0_ref, out_ref, *, lr, epochs, n):
    # xs_ref : (8, Np) f32 VMEM -> rows [x0, x1, mask, y, 0, 0, 0, 0] (lane-dense)
    # p0_ref : (3,)    f32 SMEM -> [w0, w1, b]
    # out_ref: (1, 4)  f32 VMEM -> [w0, w1, b, last_pre_update_loss]
    two_inv_n = 2.0 / n
    xs = xs_ref[...]                   # loop-invariant reduction stack (1 vreg)
    x0 = xs[0:1, :]
    x1 = xs[1:2, :]
    y = xs[3:4, :]

    w0 = jnp.full((1, 1), p0_ref[0], jnp.float32)
    w1 = jnp.full((1, 1), p0_ref[1], jnp.float32)
    bb = jnp.full((1, 1), p0_ref[2], jnp.float32)
    loss = jnp.zeros((1, 1), jnp.float32)

    def sgd_step(_, carry):
        w0, w1, bb, _ = carry
        # forward + dL/dy_hat (padded lanes give nonzero g, but every reduction
        # row there is zero, so they contribute nothing).
        g = (x0 * w0 + x1 * w1 + bb - y) * two_inv_n          # (1, Np), VPU
        # single fused cross-lane reduce over the whole stack:
        sums = jnp.sum(xs * g, axis=-1, keepdims=True)        # (8, 1), one XLU reduce
        dw0 = sums[0:1, :]                                    # sum(g * x0)
        dw1 = sums[1:2, :]                                    # sum(g * x1)
        db = sums[2:3, :]                                     # sum(g * mask)
        s_gy = sums[3:4, :]                                   # sum(g * y)
        # pre-update MSE recovered from the same sums (tiny (1,1) VPU math):
        # loss = sum(err^2)/n = 0.5*(w0*dw0 + w1*dw1 + b*db - sum(g*y))
        loss = 0.5 * (w0 * dw0 + w1 * dw1 + bb * db - s_gy)
        return (w0 - lr * dw0, w1 - lr * dw1, bb - lr * db, loss)

    w0, w1, bb, loss = lax.fori_loop(0, epochs, sgd_step, (w0, w1, bb, loss),
                                     unroll=8)
    # single epilogue store instead of four masked single-lane stores
    out_ref[...] = jnp.concatenate([w0, w1, bb, loss], axis=1)


@functools.partial(jax.jit, static_argnames=("lr", "epochs"))
def linear_train(x, y, w, b, *, lr, epochs):
    """Run `epochs` SGD steps of MSE linear regression fully inside one kernel.

    Returned loss is the pre-update loss of the final epoch (matches the
    PyTorch loop's train_step return).  If epochs == 0 the loss is 0.0.
    """
    n, in_f = x.shape
    assert in_f == 2 and w.shape == (1, 2)
    n_pad = max(LANES, pl.cdiv(n, LANES) * LANES)

    x_f = jnp.asarray(x, jnp.float32)
    y_f = jnp.asarray(y, jnp.float32).reshape(1, n)
    mask = jnp.ones((1, n), jnp.float32)                      # validity mask row
    xs = jnp.concatenate([x_f.T, mask, y_f], axis=0)          # (4, n) = [x0;x1;mask;y]
    xs = jnp.pad(xs, ((0, 8 - xs.shape[0]), (0, n_pad - n)))  # (8, n_pad), zero fill
    p0 = jnp.concatenate([jnp.asarray(w, jnp.float32).reshape(-1),
                          jnp.asarray(b, jnp.float32).reshape(-1)])  # (3,) -> SMEM

    kernel = functools.partial(_fused_train_kernel, lr=float(lr),
                               epochs=int(epochs), n=n)
    out = pl.pallas_call(
        kernel,
        out_shape=jax.ShapeDtypeStruct((1, 4), jnp.float32),
        in_specs=[
            pl.BlockSpec(memory_space=pltpu.MemorySpace.VMEM),   # xs stack
            pl.BlockSpec(memory_space=pltpu.MemorySpace.SMEM),   # initial params
        ],
        out_specs=pl.BlockSpec(memory_space=pltpu.MemorySpace.VMEM),
    )(xs, p0)
    w_new = out[0, 0:2].reshape(1, 2)
    b_new = out[0, 2:3]
    last_loss = out[0, 3]
    return w_new, b_new, last_loss


def _train_reference(x, y, w, b, lr, epochs):
    """Pure-JAX f32 reference for the fused training kernel."""
    x0 = x[:, 0]
    x1 = x[:, 1]
    yv = y[:, 0]
    n = x.shape[0]

    def step(_, carry):
        w0, w1, bb, _ = carry
        y_hat = x0 * w0 + x1 * w1 + bb
        err = y_hat - yv
        loss = jnp.sum(err * err) / n
        g = err * (2.0 / n)
        return (w0 - lr * jnp.sum(g * x0),
                w1 - lr * jnp.sum(g * x1),
                bb - lr * jnp.sum(g),
                loss)

    w0, w1, bb, loss = lax.fori_loop(
        0, epochs, step, (w[0, 0], w[0, 1], b[0], jnp.float32(0.0)))
    return jnp.stack([w0, w1]).reshape(1, 2), bb.reshape(1), loss


if __name__ == "__main__":
    # Dataset exactly as in the PyTorch script.
    x1 = np.arange(-10, 10.0).reshape((20, 1))
    x2 = np.arange(-20, 20.0, 2).reshape((20, 1))
    X = np.concatenate([x1, x2], axis=1).astype(np.float32)                  # (20, 2)
    Y = (2.5 + 3.59 * X[:, 0] - 7.8 * X[:, 1]).reshape(20, 1).astype(np.float32)

    # Deterministic parameter init mirroring torch.nn.Linear(2, 1):
    # uniform(-1/sqrt(in_features), 1/sqrt(in_features)) for both W and b.
    key = jax.random.PRNGKey(0)
    kw, kb = jax.random.split(key)
    bound = 1.0 / np.sqrt(2.0)
    W = jax.random.uniform(kw, (1, 2), jnp.float32, minval=-bound, maxval=bound)
    b = jax.random.uniform(kb, (1,), jnp.float32, minval=-bound, maxval=bound)

    x = jnp.asarray(X)
    y = jnp.asarray(Y)

    # ---- forward pass (the module's forward) ----
    out = linear_forward(x, W, b)
    out = jax.block_until_ready(out)
    assert out.shape == (20, 1)
    Wn, bn = np.asarray(W), np.asarray(b)
    ref = X[:, 0:1] * Wn[0, 0] + X[:, 1:2] * Wn[0, 1] + bn[0]
    np.testing.assert_allclose(np.asarray(out), ref.reshape(20, 1), rtol=1e-5, atol=1e-5)

    # ---- fused training loop (forward + MSE grad + SGD) in ONE pallas_call ----
    # TODO(synk): per-epoch loss printing / state_dict dump from train() is host I/O,
    # not kernel work; only the numeric training loop is fused here.
    LR, EPOCHS = 1e-4, 200
    w_new, b_new, last_loss = linear_train(x, y, W, b, lr=LR, epochs=EPOCHS)
    jax.block_until_ready((w_new, b_new, last_loss))
    w_ref, b_ref, loss_ref = _train_reference(x, y, W, b, LR, EPOCHS)
    np.testing.assert_allclose(np.asarray(w_new), np.asarray(w_ref), rtol=1e-2, atol=1e-2)
    np.testing.assert_allclose(np.asarray(b_new), np.asarray(b_ref), rtol=1e-2, atol=1e-2)
    np.testing.assert_allclose(float(last_loss), float(loss_ref), rtol=1e-2, atol=1e-2)

    print("KERNEL_OK")
</pallas_src>

<mosaic_0001>
module attributes {stable_mosaic.version = 11 : i64} {
  func.func @_linear_forward_kernel(%arg0: memref<2x128xf32, #tpu.memory_space<vmem>>, %arg1: memref<2xf32, #tpu.memory_space<smem>>, %arg2: memref<1xf32, #tpu.memory_space<smem>>, %arg3: memref<1x128xf32, #tpu.memory_space<vmem>>) attributes {dimension_semantics = [], scalar_prefetch = 0 : i64, scratch_operands = 0 : i64, tpu.core_type = #tpu.core_type<tc>} {
    %c0 = arith.constant 0 : index
    %0 = memref.load %arg2[%c0] : memref<1xf32, #tpu.memory_space<smem>>
    %1 = vector.broadcast %0 : f32 to vector<1x128xf32>
    %c0_0 = arith.constant 0 : index
    %c0_1 = arith.constant 0 : index
    %2 = vector.load %arg0[%c0_0, %c0_1] : memref<2x128xf32, #tpu.memory_space<vmem>>, vector<1x128xf32>
    %c0_2 = arith.constant 0 : index
    %3 = memref.load %arg1[%c0_2] : memref<2xf32, #tpu.memory_space<smem>>
    %4 = vector.broadcast %3 : f32 to vector<1x128xf32>
    %5 = arith.mulf %2, %4 : vector<1x128xf32>
    %6 = arith.addf %1, %5 : vector<1x128xf32>
    %c1 = arith.constant 1 : index
    %c0_3 = arith.constant 0 : index
    %7 = vector.load %arg0[%c1, %c0_3] : memref<2x128xf32, #tpu.memory_space<vmem>>, vector<1x128xf32>
    %c1_4 = arith.constant 1 : index
    %8 = memref.load %arg1[%c1_4] : memref<2xf32, #tpu.memory_space<smem>>
    %9 = vector.broadcast %8 : f32 to vector<1x128xf32>
    %10 = arith.mulf %7, %9 : vector<1x128xf32>
    %11 = arith.addf %6, %10 : vector<1x128xf32>
    %c0_5 = arith.constant 0 : index
    %c0_6 = arith.constant 0 : index
    %12 = vector.load %arg3[%c0_5, %c0_6] : memref<1x128xf32, #tpu.memory_space<vmem>>, vector<1x128xf32>
    tpu.vector_store %arg3[%c0_5, %c0_6], %11 {strides = array<i32>} : memref<1x128xf32, #tpu.memory_space<vmem>>, vector<1x128xf32>,
    return
  }
}

</mosaic_0001>

<bundles_post_ra>
// kernel: linear_forward.1
= control target key start
LH: loop header
LB: loop body
LE: loop exit
PB: predicated region body
PF: predicated region fallthrough
CT: control target
= control target key end

     0   :  { %9 = vsyncpa [#allocation4], 0  ;;  %s62_s15 = smov [#allocation3]   ;;  %s98_s0 = inlined_call_operand.vmem [shape: f32[2,128], index: 0, kind: input, shape index: {}]   ;;  %s99_s1 = inlined_call_operand.vmem [shape: f32[2], index: 1, kind: input, shape index: {}]   ;;  %s100_s2 = inlined_call_operand.<no memory space> [shape: f32[1], index: 2, kind: input, shape index: {}]   ;;  %s101_s3 = inlined_call_operand.vmem [shape: f32[1,128], index: 3, kind: output, shape index: {}]  }
   0x1   :  { %s17_s14 = sshll.u32 %s99_s1, 4  ;;  %s18_s14 = int_to_ptr.vmem [resolvable:$true] %s17_s14 }
   0x2   :  { %20 = dma.vmem_to_smem %s18_s14, 16, %s62_s15, [#allocation4]  }
   0x3   :  { %60 = dma.done.wait [#allocation4], 16  }
   0x4   :  { %61 = vsyncadd [#allocation4], 4294967280 }
   0x5   :  { %27 = sfence }
   0x6   :  { %s31_s16 = sld [smem:[#allocation3]]  ;;  %v30_v0 = vld [vmem:[%s98_s0] sm:$0x1]  ;;  %v35_v1 = vld [vmem:[%s98_s0 + $0x1] sm:$0x1]  ;;  %v29_v2 = vstv %s100_s2 }
   0x7   :  { %s46_s17 = sld [smem:[#allocation3 + $0x1]] }
   0xc   :  { %v32_v3 = vstv %s31_s16 }
   0xd   :  { %v33_v4 = vmul.f32 %v32_v3, %v30_v0  ;;  %v37_v5 = vstv %s46_s17 }
   0xe   :  { %v38_v6 = vmul.f32 %v37_v5, %v35_v1 }
   0xf   :  { %v34_v7 = vadd.f32 %v33_v4, %v29_v2 }
  0x11   :  { %v39_v8 = vadd.f32 %v38_v6, %v34_v7 }
  0x13   :  { %40 = vst [vmem:[%s101_s3] sm:$0x1] %v39_v8 }
  0x14   :  { %45 = vsyncpa [#allocation4], 1 }

</bundles_post_ra>
